<compile_context>
chip_gen: v7x
topology: tpu7x:2x2x1
jax: 0.10.0
libtpu: 0.0.40
codegen_flags: <defaults>
</compile_context>

<pallas_src>
import jax
import jax.numpy as jnp
from jax.experimental import pallas as pl
from jax.experimental.pallas import tpu as pltpu


def _material_attention_kernel(feat_ref, w1t_ref, b1_ref, w2t_ref, b2_ref,
                               out_ref):
    # feat_ref: (Bt, C, HW) f32 block (full extent on C and HW).
    xf = feat_ref[...]                                     # f32

    # AdaptiveAvgPool2d(1) + AdaptiveMaxPool2d(1), summed.  Full-extent HW block
    # -> Mosaic handles any ragged tail, reductions are exact.
    pooled = jnp.mean(xf, axis=-1) + jnp.max(xf, axis=-1)  # (Bt, C)

    # channel_latent: 1x1 conv (BN folded into weight+bias) + ReLU, batched.
    latent = jnp.dot(pooled, w1t_ref[...],
                     preferred_element_type=jnp.float32) + b1_ref[...]
    latent = jnp.maximum(latent, 0.0)                      # (Bt, Ci)

    # Rank-1 affinity (pooled map is 1x1) -> softmax -> bmm, done on the VPU.
    aff = latent[:, :, None] * latent[:, None, :]          # (Bt, Ci, Ci)
    m = jnp.max(aff, axis=-1, keepdims=True)
    e = jnp.exp(aff - m)
    p = e * pl.reciprocal(jnp.sum(e, axis=-1, keepdims=True), approx=True)
    node = jnp.sum(p * latent[:, None, :], axis=-1)        # (Bt, Ci)

    # channel_up: 1x1 conv (BN folded) + ReLU, then sigmoid gate.
    att = jnp.dot(node, w2t_ref[...],
                  preferred_element_type=jnp.float32) + b2_ref[...]
    att = jax.nn.sigmoid(jnp.maximum(att, 0.0))            # (Bt, C)

    # outs = att * feat + feat  ==  feat * (att + 1): one fused broadcast pass.
    gate = att + 1.0                                       # (Bt, C)
    out_ref[...] = (feat_ref[...] * gate[:, :, None]).astype(out_ref.dtype)


def _vmem_budget_bytes():
    """Generation-aware VMEM budget for the feat-stream pipeline."""
    try:
        cap = int(pltpu.get_tpu_info().vmem_capacity_bytes)
    except Exception:
        cap = 64 * 1024 * 1024        # conservative (v7x-sized) fallback
    # ~40 MiB on a 64 MiB part (v7x), 48 MiB on 128 MiB parts (v5e/v6e);
    # leaves headroom for double buffers, weights and compiler scratch.
    return int(min(48 * 1024 * 1024, (cap * 5) // 8))


def _choose_batch_tile(B, C, HW, out_itemsize, vmem_budget):
    feat_bytes = C * HW * 4                                 # f32 feat per batch elem
    # Double-buffered f32 input block + double-buffered output block + one
    # f32-sized temp for the fused elementwise pass.
    per_b = C * HW * (2 * 4 + 2 * out_itemsize + 4)
    bt_cap = max(1, int((vmem_budget - (2 << 20)) // per_b))

    # Pipeline depth: aim for >= 8 grid steps (>= 4 per TensorCore on 2-core
    # chips) so HBM transfers overlap compute ...
    bt_depth = max(1, pl.cdiv(B, 8))
    # ... but each step should move >= ~0.5 MiB of feat so the ~0.35 us/step
    # overhead stays amortized.
    bt_floor = max(1, pl.cdiv(512 * 1024, feat_bytes))
    bt = max(bt_depth, bt_floor)

    # Never collapse to a single grid step when B >= 2 (megacore sharding),
    # and never exceed the VMEM cap or B.
    if B >= 2:
        bt = min(bt, pl.cdiv(B, 2))
    bt = max(1, min(bt, bt_cap, B))

    # Rebalance so every grid step processes (nearly) the same number of rows.
    g = pl.cdiv(B, bt)
    bt = pl.cdiv(B, g)
    return int(bt)


def material_attention(feat, w1_eff, b1_eff, w2_eff, b2_eff,
                       *, out_dtype=jnp.bfloat16):
    """feat: (B, C, H, W) float32; BN-folded 1x1-conv weights/biases.

    w1_eff: (Ci, C), b1_eff: (Ci,), w2_eff: (C, Ci), b2_eff: (C,)
    Pass out_dtype=jnp.float32 for bit-level module fidelity (only remaining
    deviation is the approx softmax reciprocal).
    """
    B, C, H, W = feat.shape
    HW = H * W
    Ci = w1_eff.shape[0]

    # Contiguous reshape: no HBM copy under jit.  Kernel reads f32 directly.
    x = feat.reshape(B, C, HW)

    budget = _vmem_budget_bytes()
    bt = _choose_batch_tile(B, C, HW, jnp.dtype(out_dtype).itemsize, budget)
    grid = (pl.cdiv(B, bt),)

    # Lay weights out so the fused-batch dim is the M dim of every dot and the
    # biases broadcast along lanes (no lane-width-1 operands).
    w1t = jnp.asarray(w1_eff, jnp.float32).T               # (C, Ci)
    w2t = jnp.asarray(w2_eff, jnp.float32).T               # (Ci, C)
    b1 = jnp.asarray(b1_eff, jnp.float32).reshape(1, Ci)
    b2 = jnp.asarray(b2_eff, jnp.float32).reshape(1, C)

    out = pl.pallas_call(
        _material_attention_kernel,
        out_shape=jax.ShapeDtypeStruct((B, C, HW), out_dtype),
        grid_spec=pltpu.PrefetchScalarGridSpec(
            num_scalar_prefetch=0,
            grid=grid,
            in_specs=[
                pl.BlockSpec((bt, C, HW), lambda b: (b, 0, 0)),
                pl.BlockSpec((C, Ci), lambda b: (0, 0)),
                pl.BlockSpec((1, Ci), lambda b: (0, 0)),
                pl.BlockSpec((Ci, C), lambda b: (0, 0)),
                pl.BlockSpec((1, C), lambda b: (0, 0)),
            ],
            out_specs=pl.BlockSpec((bt, C, HW), lambda b: (b, 0, 0)),
        ),
        compiler_params=pltpu.CompilerParams(
            dimension_semantics=("parallel",),
            vmem_limit_bytes=budget),
    )(x, w1t, b1, w2t, b2)

    return out.reshape(B, C, H, W)


def fold_bn(w, gamma, beta, mean, var, eps=1e-5):
    """Fold eval-mode BatchNorm (after a bias-free 1x1 conv) into weight+bias."""
    scale = gamma / jnp.sqrt(var + eps)
    w_eff = w * scale[:, None]
    b_eff = beta - mean * scale
    return w_eff, b_eff


def reference_jax(feat, w1_eff, b1_eff, w2_eff, b2_eff):
    """Pure-JAX f32 reference with exact module semantics."""
    B, C, H, W = feat.shape
    xf = feat.astype(jnp.float32).reshape(B, C, H * W)
    pooled = jnp.mean(xf, -1) + jnp.max(xf, -1)                      # (B, C)
    latent = jnp.maximum(pooled @ w1_eff.T + b1_eff[None, :], 0.0)   # (B, Ci)
    aff = latent[:, :, None] * latent[:, None, :]                    # (B, Ci, Ci)
    p = jax.nn.softmax(aff, axis=-1)
    node = jnp.einsum('bij,bj->bi', p, latent)                       # (B, Ci)
    att = jax.nn.sigmoid(jnp.maximum(node @ w2_eff.T + b2_eff[None, :], 0.0))
    out = xf * (att[:, :, None] + 1.0)
    return out.reshape(B, C, H, W)


if __name__ == "__main__":
    # Module config: in_channels=64, ratio=8 -> inter_channel=8
    B, C, H, W = 2, 64, 16, 16
    ratio = 8
    Ci = C // ratio

    key = jax.random.PRNGKey(0)
    keys = jax.random.split(key, 11)

    feat = jax.random.normal(keys[0], (B, C, H, W), dtype=jnp.float32)

    # 1x1 conv weights (out, in), no bias (matches nn.Conv2d(bias=False)).
    w1 = jax.random.normal(keys[1], (Ci, C), dtype=jnp.float32) * 0.1
    w2 = jax.random.normal(keys[2], (C, Ci), dtype=jnp.float32) * 0.1

    # Eval-mode BatchNorm params for both norm layers.
    g1 = 1.0 + 0.1 * jax.random.normal(keys[3], (Ci,), dtype=jnp.float32)
    be1 = 0.05 * jax.random.normal(keys[4], (Ci,), dtype=jnp.float32)
    m1 = 0.1 * jax.random.normal(keys[5], (Ci,), dtype=jnp.float32)
    v1 = 1.0 + 0.1 * jnp.abs(jax.random.normal(keys[6], (Ci,), dtype=jnp.float32))

    g2 = 1.0 + 0.1 * jax.random.normal(keys[7], (C,), dtype=jnp.float32)
    be2 = 0.05 * jax.random.normal(keys[8], (C,), dtype=jnp.float32)
    m2 = 0.1 * jax.random.normal(keys[9], (C,), dtype=jnp.float32)
    v2 = 1.0 + 0.1 * jnp.abs(jax.random.normal(keys[10], (C,), dtype=jnp.float32))

    w1_eff, b1_eff = fold_bn(w1, g1, be1, m1, v1)
    w2_eff, b2_eff = fold_bn(w2, g2, be2, m2, v2)

    out = material_attention(feat, w1_eff, b1_eff, w2_eff, b2_eff)
    out = jax.block_until_ready(out)

    # Reference: exact f32 module semantics; tolerance covers the bf16 output
    # rounding and the approx softmax reciprocal.
    ref = reference_jax(feat, w1_eff, b1_eff, w2_eff, b2_eff)

    assert out.shape == (B, C, H, W)
    assert jnp.allclose(out.astype(jnp.float32), ref, atol=2e-2, rtol=2e-2), (
        "mismatch vs JAX reference: max abs err = "
        f"{jnp.max(jnp.abs(out.astype(jnp.float32) - ref))}")

    print("KERNEL_OK")
</pallas_src>

<mosaic_0001>
module attributes {stable_mosaic.version = 11 : i64} {
  func.func @_material_attention_kernel(%arg0: i32, %arg1: memref<1x64x256xf32, #tpu.memory_space<vmem>>, %arg2: memref<64x8xf32, #tpu.memory_space<vmem>>, %arg3: memref<1x8xf32, #tpu.memory_space<vmem>>, %arg4: memref<8x64xf32, #tpu.memory_space<vmem>>, %arg5: memref<1x64xf32, #tpu.memory_space<vmem>>, %arg6: memref<1x64x256xbf16, #tpu.memory_space<vmem>>) attributes {dimension_semantics = [#tpu.dimension_semantics<parallel>], iteration_bounds = array<i64: 2>, scalar_prefetch = 0 : i64, scratch_operands = 0 : i64, tpu.core_type = #tpu.core_type<tc>, window_params = [{transform_indices = @transform_0, window_bounds = array<i64: 1, 64, 256>}, {pipeline_mode = #tpu.pipeline_mode<synchronous>, transform_indices = @transform_1, window_bounds = array<i64: 64, 8>}, {pipeline_mode = #tpu.pipeline_mode<synchronous>, transform_indices = @transform_2, window_bounds = array<i64: 1, 8>}, {pipeline_mode = #tpu.pipeline_mode<synchronous>, transform_indices = @transform_3, window_bounds = array<i64: 8, 64>}, {pipeline_mode = #tpu.pipeline_mode<synchronous>, transform_indices = @transform_4, window_bounds = array<i64: 1, 64>}, {transform_indices = @transform_5, window_bounds = array<i64: 1, 64, 256>}]} {
    %c0 = arith.constant 0 : index
    %c0_0 = arith.constant 0 : index
    %c0_1 = arith.constant 0 : index
    %0 = vector.load %arg1[%c0, %c0_0, %c0_1] : memref<1x64x256xf32, #tpu.memory_space<vmem>>, vector<1x64x256xf32>
    %cst = arith.constant dense<0.000000e+00> : vector<1x64xf32>
    %1 = vector.multi_reduction <add>, %0, %cst [2] : vector<1x64x256xf32> to vector<1x64xf32>
    %cst_2 = arith.constant 2.560000e+02 : f32
    %2 = vector.broadcast %cst_2 : f32 to vector<1x64xf32>
    %3 = arith.divf %1, %2 : vector<1x64xf32>
    %cst_3 = arith.constant dense<0xFF800000> : vector<1x64xf32>
    %4 = vector.multi_reduction <maximumf>, %0, %cst_3 [2] : vector<1x64x256xf32> to vector<1x64xf32>
    %5 = arith.addf %3, %4 : vector<1x64xf32>
    %c0_4 = arith.constant 0 : index
    %c0_5 = arith.constant 0 : index
    %6 = vector.load %arg2[%c0_4, %c0_5] : memref<64x8xf32, #tpu.memory_space<vmem>>, vector<64x8xf32>
    %cst_6 = arith.constant dense<0.000000e+00> : vector<1x8xf32>
    %7 = tpu.matmul %5, %6, %cst_6 {dimension_numbers = #tpu.dot_dimension_numbers<[1], [0], [0], [1], [0, 0, 1, 1], [], []>} : vector<1x64xf32>, vector<64x8xf32>, vector<1x8xf32> -> vector<1x8xf32>
    %c0_7 = arith.constant 0 : index
    %c0_8 = arith.constant 0 : index
    %8 = vector.load %arg3[%c0_7, %c0_8] : memref<1x8xf32, #tpu.memory_space<vmem>>, vector<1x8xf32>
    %9 = arith.addf %7, %8 : vector<1x8xf32>
    %cst_9 = arith.constant 0.000000e+00 : f32
    %10 = vector.broadcast %cst_9 : f32 to vector<1x8xf32>
    %11 = arith.maximumf %9, %10 : vector<1x8xf32>
    %12 = vector.shape_cast %11 : vector<1x8xf32> to vector<1x8x1xf32>
    %13 = vector.shape_cast %11 : vector<1x8xf32> to vector<1x1x8xf32>
    %14 = vector.broadcast %12 : vector<1x8x1xf32> to vector<1x8x8xf32>
    %15 = vector.broadcast %13 : vector<1x1x8xf32> to vector<1x8x8xf32>
    %16 = arith.mulf %14, %15 : vector<1x8x8xf32>
    %cst_10 = arith.constant dense<0xFF800000> : vector<1x8xf32>
    %17 = vector.multi_reduction <maximumf>, %16, %cst_10 [2] : vector<1x8x8xf32> to vector<1x8xf32>
    %18 = vector.shape_cast %17 : vector<1x8xf32> to vector<1x8x1xf32>
    %19 = vector.broadcast %18 : vector<1x8x1xf32> to vector<1x8x8xf32>
    %20 = arith.subf %16, %19 : vector<1x8x8xf32>
    %21 = math.exp %20 : vector<1x8x8xf32>
    %cst_11 = arith.constant dense<0.000000e+00> : vector<1x8xf32>
    %22 = vector.multi_reduction <add>, %21, %cst_11 [2] : vector<1x8x8xf32> to vector<1x8xf32>
    %23 = vector.shape_cast %22 : vector<1x8xf32> to vector<1x8x1xf32>
    %24 = tpu.reciprocal %23 {approx = true} : vector<1x8x1xf32> -> vector<1x8x1xf32>
    %25 = vector.broadcast %24 : vector<1x8x1xf32> to vector<1x8x8xf32>
    %26 = arith.mulf %21, %25 : vector<1x8x8xf32>
    %27 = vector.shape_cast %11 : vector<1x8xf32> to vector<1x1x8xf32>
    %28 = vector.broadcast %27 : vector<1x1x8xf32> to vector<1x8x8xf32>
    %29 = arith.mulf %26, %28 : vector<1x8x8xf32>
    %cst_12 = arith.constant dense<0.000000e+00> : vector<1x8xf32>
    %30 = vector.multi_reduction <add>, %29, %cst_12 [2] : vector<1x8x8xf32> to vector<1x8xf32>
    %c0_13 = arith.constant 0 : index
    %c0_14 = arith.constant 0 : index
    %31 = vector.load %arg4[%c0_13, %c0_14] : memref<8x64xf32, #tpu.memory_space<vmem>>, vector<8x64xf32>
    %cst_15 = arith.constant dense<0.000000e+00> : vector<1x64xf32>
    %32 = tpu.matmul %30, %31, %cst_15 {dimension_numbers = #tpu.dot_dimension_numbers<[1], [0], [0], [1], [0, 0, 1, 1], [], []>} : vector<1x8xf32>, vector<8x64xf32>, vector<1x64xf32> -> vector<1x64xf32>
    %c0_16 = arith.constant 0 : index
    %c0_17 = arith.constant 0 : index
    %33 = vector.load %arg5[%c0_16, %c0_17] : memref<1x64xf32, #tpu.memory_space<vmem>>, vector<1x64xf32>
    %34 = arith.addf %32, %33 : vector<1x64xf32>
    %cst_18 = arith.constant 0.000000e+00 : f32
    %35 = vector.broadcast %cst_18 : f32 to vector<1x64xf32>
    %36 = arith.maximumf %34, %35 : vector<1x64xf32>
    %37 = arith.negf %36 : vector<1x64xf32>
    %38 = math.exp %37 : vector<1x64xf32>
    %cst_19 = arith.constant 1.000000e+00 : f32
    %39 = vector.broadcast %cst_19 : f32 to vector<1x64xf32>
    %40 = arith.addf %39, %38 : vector<1x64xf32>
    %41 = arith.divf %39, %40 : vector<1x64xf32>
    %cst_20 = arith.constant 1.000000e+00 : f32
    %42 = vector.broadcast %cst_20 : f32 to vector<1x64xf32>
    %43 = arith.addf %41, %42 : vector<1x64xf32>
    %c0_21 = arith.constant 0 : index
    %c0_22 = arith.constant 0 : index
    %c0_23 = arith.constant 0 : index
    %44 = vector.load %arg1[%c0_21, %c0_22, %c0_23] : memref<1x64x256xf32, #tpu.memory_space<vmem>>, vector<1x64x256xf32>
    %45 = vector.shape_cast %43 : vector<1x64xf32> to vector<1x64x1xf32>
    %46 = vector.broadcast %45 : vector<1x64x1xf32> to vector<1x64x256xf32>
    %47 = arith.mulf %44, %46 : vector<1x64x256xf32>
    %48 = arith.truncf %47 : vector<1x64x256xf32> to vector<1x64x256xbf16>
    %c0_24 = arith.constant 0 : index
    %c0_25 = arith.constant 0 : index
    %c0_26 = arith.constant 0 : index
    %49 = vector.load %arg6[%c0_24, %c0_25, %c0_26] : memref<1x64x256xbf16, #tpu.memory_space<vmem>>, vector<1x64x256xbf16>
    tpu.vector_store %arg6[%c0_24, %c0_25, %c0_26], %48 {strides = array<i32>} : memref<1x64x256xbf16, #tpu.memory_space<vmem>>, vector<1x64x256xbf16>,
    return
  }
  func.func @transform_0(%arg0: i32) -> (i32, i32, i32) {
    %c0_i32 = arith.constant 0 : i32
    %c0_i32_0 = arith.constant 0 : i32
    %c0_i32_1 = arith.constant 0 : i32
    return %arg0, %c0_i32, %c0_i32_0 : i32, i32, i32
  }
  func.func @transform_1(%arg0: i32) -> (i32, i32) {
    %c0_i32 = arith.constant 0 : i32
    %c0_i32_0 = arith.constant 0 : i32
    %c0_i32_1 = arith.constant 0 : i32
    return %c0_i32, %c0_i32_0 : i32, i32
  }
  func.func @transform_2(%arg0: i32) -> (i32, i32) {
    %c0_i32 = arith.constant 0 : i32
    %c0_i32_0 = arith.constant 0 : i32
    %c0_i32_1 = arith.constant 0 : i32
    return %c0_i32, %c0_i32_0 : i32, i32
  }
  func.func @transform_3(%arg0: i32) -> (i32, i32) {
    %c0_i32 = arith.constant 0 : i32
    %c0_i32_0 = arith.constant 0 : i32
    %c0_i32_1 = arith.constant 0 : i32
    return %c0_i32, %c0_i32_0 : i32, i32
  }
  func.func @transform_4(%arg0: i32) -> (i32, i32) {
    %c0_i32 = arith.constant 0 : i32
    %c0_i32_0 = arith.constant 0 : i32
    %c0_i32_1 = arith.constant 0 : i32
    return %c0_i32, %c0_i32_0 : i32, i32
  }
  func.func @transform_5(%arg0: i32) -> (i32, i32, i32) {
    %c0_i32 = arith.constant 0 : i32
    %c0_i32_0 = arith.constant 0 : i32
    %c0_i32_1 = arith.constant 0 : i32
    return %arg0, %c0_i32, %c0_i32_0 : i32, i32, i32
  }
}

</mosaic_0001>

<bundles_post_ra>
// kernel: tpu_custom_call.1
= control target key start
LH: loop header
LB: loop body
LE: loop exit
PB: predicated region body
PF: predicated region fallthrough
CT: control target
= control target key end

     0   :  { %10 = vsyncpa [#allocation3], 0  ;;  %s1379_s0 = inlined_call_operand.hbm [shape: f32[2,64,256], index: 0, kind: input, shape index: {}]   ;;  %s1380_s1 = inlined_call_operand.vmem [shape: f32[64,8], index: 1, kind: input, shape index: {}]   ;;  %s1381_s2 = inlined_call_operand.vmem [shape: f32[1,8], index: 2, kind: input, shape index: {}]   ;;  %s1382_s3 = inlined_call_operand.vmem [shape: f32[8,64], index: 3, kind: input, shape index: {}]   ;;  %s1383_s4 = inlined_call_operand.vmem [shape: f32[1,64], index: 4, kind: input, shape index: {}]   ;;  %s1384_s5 = inlined_call_operand.hbm [shape: bf16[2,64,256], index: 5, kind: output, shape index: {}]  }
   0x1   :  { %12 = vsyncpa [#allocation3 + $0x1], 0 }
   0x2   :  { %13 = vsyncpa [#allocation4], 0 }
   0x3   :  { %15 = vsyncpa [#allocation4 + $0x1], 0  ;;  %s1055_s18 = smov 0   ;;  %s1057_s19 = smov 0  }
   0x4   :  { %s1059_s20 = smov 0   ;;  %s1061_s21 = smov 0  }
   0x5 LB: > { %s1076_s22 = sadd.s32 4294967295, %s1014_s21   ;;  %s775_s23 = sadd.s32 4294967294, %s1014_s21   ;;  %s1014_s21 = sphi %s1061_s21, %s1397_s21   ;;  %s1010_s20 = sphi %s1059_s20, %s1396_s20   ;;  %s1006_s19 = sphi %s1057_s19, %s1395_s19   ;;  %s1002_s18 = sphi %s1055_s18, %s1394_s18  }
   0x6   : > { %s1080_s24 = sadd.s32 1, %s1014_s21   ;;  %s28_s25 = sadd.s32 1, %s1010_s20 }
   0x7   : > { %s25_s26 = ssub.s32 %s1014_s21, %s1080_s24  ;;  %p35_p0 = scmp.ne.s32.totalorder %s1010_s20, %s1006_s19 }
   0x8   : > { %p26_p1 = scmp.eq.s32.totalorder %s25_s26, 0  ;;  %p36_p2 = scmp.eq.s32.totalorder %s1014_s21, 0 }
   0x9   : > { %p41_p3 = scmp.ne.s32.totalorder %s1006_s19, %s1002_s18  ;;  %p42_p4 = scmp.eq.s32.totalorder %s1076_s22, 0 }
   0xa   : > { %s1092_s27 = scalar_select %p26_p1, %s1010_s20, %s28_s25  }
   0xb   : > { %p1094_p5 = por %p36_p2, %p35_p0  ;;  %p1098_p6 = por %p42_p4, %p41_p3 }
   0xc   : > { %p149_p7 = scmp.eq.s32.totalorder %s1076_s22, 1  ;;  %p155_p8 = scmp.eq.s32.totalorder %s775_s23, 1 }
   0xd   : > { %p869_p10 = scmp.lt.s32.totalorder %s1014_s21, 2  ;;  %s187_s7 = sand.u32 1, %s1010_s20  }
   0xe   : > { %p1105_p11 = por %p149_p7, %p35_p0  ;;  %p1109_p12 = por %p155_p8, %p41_p3 }
   0xf   : > { %s800_s8 = sshll.u32 %s1014_s21, 11  ;;  %s778_s9 = sshll.u32 %s187_s7, 7 }
  0x10   : > { %s1388_s30 = scalar_select %p1105_p11, 1, 0 }
  0x11   : > { %s1389_s6 = scalar_select %p1109_p12, 1, 0 }
  0x12   : > { %s1118_s12 = scalar_lea.hbm %s1379_s0, %s800_s8  ;;  %s191_s13 = scalar_lea.vmem [#allocation2], %s778_s9 }
  0x13   : > { %s198_s14 = sshll.u32 %s191_s13, 4  ;;  %p1122_p13 = pnand %p869_p10, %p1094_p5  ;;  %s1126_s14 = int_to_ptr.vmem [resolvable:$true] %s198_s14 }
  0x14   : > { %s1128_s16 = scalar_lea.sflag [#allocation3], %s187_s7  ;;  %s918_s17 = scalar_lea.hbm %s1118_s12, 2048 }
  0x15   : > { %p919_p0 = scmp.ne.s32.totalorder %s1118_s12, %s918_s17  ;;  %p920_p1 = pneg %p1122_p13 }
  0x16   : > { %s923_s26 = scalar_lea.hbm %s1379_s0, 4096  ;;  %p924_p4 = scmp.lt.u32.totalorder %s1118_s12, %s1379_s0 }
  0x17   : > { %p921_p2 = pnand %p920_p1, %p919_p0  ;;  %p925_p5 = scmp.lt.u32.totalorder %s923_s26, %s918_s17 }
  0x18   : > { %p927_p8 = scmp.lt.u32.totalorder %s918_s17, %s1118_s12 }
  0x19   : > { %p922_p3 = pneg %p921_p2  ;;  %p926_p7 = por %p925_p5, %p924_p4 }
  0x1b   : > { %p928_p10 = por %p927_p8, %p926_p7 }
  0x1d   : > { %p929_p9 = pnand %p928_p10, %p922_p3 }
  0x1f   : > { %932 = shalt.err (!%p929_p9)
}
  0x20   : > { %s933_s7 = scalar_lea.vmem %s1126_s14, 2048  ;;  %s1016_s9 = smov [#allocation2]  }
  0x21   : > { %p934_p0 = scmp.ne.s32.totalorder %s1126_s14, %s933_s7  ;;  %s938_s10 = sshll.u32 %s1016_s9, 4  ;;  %s939_s10 = int_to_ptr.vmem [resolvable:$false] %s938_s10 }
  0x22   : > { %s940_s11 = scalar_lea.vmem %s939_s10, 4096  ;;  %p941_p11 = scmp.lt.s32.totalorder %s1126_s14, %s939_s10 }
  0x23   : > { %p936_p2 = pnand %p934_p0, %p920_p1  ;;  %p942_p4 = scmp.lt.s32.totalorder %s940_s11, %s933_s7 }
  0x25   : > { %p937_p12 = pneg %p936_p2  ;;  %p943_p5 = por %p942_p4, %p941_p11 }
  0x27   : > { %p944_p7 = pnand %p943_p5, %p937_p12 }
  0x29   : > { %947 = shalt.err (!%p944_p7)
}
  0x2a   : > { %s1017_s13 = smov 256   ;;  %s1018_s17 = smov 16  }
  0x2b   : > { %864 = dma.hbm_to_vmem [thread:$0]  (!%p1122_p13), %s1118_s12, 2048, %s1126_s14, %s1128_s16, %s1017_s13, %s1017_s13, %s1018_s17  }
  0x2c   : > { %p781_p9 = scmp.ge.s32.totalorder %s1014_s21, 1  ;;  %p206_p1 = scmp.lt.s32.totalorder %s1014_s21, 3 }
  0x2e   : > { %p207_p3 = pnand %p781_p9, %p206_p1 }
  0x2f   : > { %s1159_s23 = sand.u32 (!%p207_p3), 1, %s1006_s19  }
  0x30   : > { %210 = sbr.rel (%p207_p3) target bundleno = 1425 (0x591), region = 40  ;;  %s782_s25 = sshll.u32 (!%p207_p3), %s1159_s23, 7 }
  0x31   : > { %s213_s26 = scalar_lea.sflag (!%p207_p3), [#allocation3], %s1159_s23  ;;  %s1163_s28 = scalar_lea.vmem (!%p207_p3), [#allocation2], %s782_s25 }
  0x37   : > { %993 = dma.done.wait (%p1098_p6), %s213_s26, 2048  }
  0x38   : > { %995 = vsyncadd (%p1098_p6), %s213_s26, 4294965248  ;;  %v1170_v0 = vld [vmem:[%s1163_s28 + $0x20] sm:$0xff]  ;;  %v1173_v1 = vld [vmem:[%s1163_s28 + $0x28] sm:$0xff]  ;;  %v1019_v35 = vmov 0.0|0.0   ;;  %vm1020_vm0 = vmmov 0   ;;  %v1021_v45 = vmov 0.0   ;;  %v341_v50 = vlaneseq }
  0x39   : > { %v1176_v2 = vld [vmem:[%s1163_s28] sm:$0xff]  ;;  %v265_v3 = vadd.f32 %v1173_v1, %v1170_v0  ;;  %v1181_v4 = vld [vmem:[%s1163_s28 + $0x8] sm:$0xff]  ;;  %v1184_v5 = vld [vmem:[%s1163_s28 + $0x30] sm:$0xff]  ;;  %v298_v16 = vmax.f32 %v1170_v0, %v1173_v1  ;;  %845 = vmatprep.subr.bf16.mxu0 %v1019_v35  ;;  %837 = vmatprep.mubr.msk.f32.mxu0 %vm1020_vm0, %v1021_v45  ;;  %vm352_vm1 = vcmask 130112   ;;  %vm359_vm2 = vcmask 195712   ;;  %s783_s9 = sshll.u32 %s1159_s23, 6 }
  0x3a   : > { %v1187_v6 = vld [vmem:[%s1163_s28 + $0x38] sm:$0xff]  ;;  %v259_v7 = vadd.f32 %v1181_v4, %v1176_v2  ;;  %v1192_v8 = vld [vmem:[%s1163_s28 + $0x10] sm:$0xff]  ;;  %v292_v13 = vmax.f32 %v1176_v2, %v1181_v4  ;;  %v1206_v14 = vld [vmem:[%s1163_s28 + $0x40] sm:$0xff]  ;;  %840 = vmatprep.subr.mxu1 %v1021_v45  ;;  %842 = vmatprep.mubr.msk.f32.mxu1 %vm1020_vm0, %v1021_v45  ;;  %v342_v53 = vand.u32 127, %v341_v50  ;;  %v1273_v56 = vshrl.u32 %v341_v50, 7  ;;  %s1306_s10 = scalar_lea.vmem [#allocation5], %s783_s9 }
  0x3b   : > { %v1195_v9 = vld [vmem:[%s1163_s28 + $0x18] sm:$0xff]  ;;  %266 = vadd.xlane.f32.xlu1 %v265_v3  ;;  %v268_v10 = vadd.f32 %v1187_v6, %v1184_v5  ;;  %v1209_v15 = vld [vmem:[%s1163_s28 + $0x48] sm:$0xff]  ;;  %v1216_v18 = vld [vmem:[%s1163_s28 + $0x50] sm:$0xff]  ;;  %v301_v20 = vmax.f32 %v1184_v5, %v1187_v6  ;;  %vm366_vm3 = vcmask 261312   ;;  %vm373_vm4 = vcmask 326912   ;;  %s809_s11 = sshll.u32 %s1076_s22, 10 }
  0x3c   : > { %260 = vadd.xlane.f32.xlu0 %v259_v7  ;;  %v262_v11 = vadd.f32 %v1195_v9, %v1192_v8  ;;  %v295_v12 = vmax.f32 %v1192_v8, %v1195_v9  ;;  %v271_v17 = vadd.f32 %v1209_v15, %v1206_v14  ;;  %v1219_v19 = vld [vmem:[%s1163_s28 + $0x58] sm:$0xff]  ;;  %v1226_v22 = vld [vmem:[%s1163_s28 + $0x60] sm:$0xff]  ;;  %v1229_v23 = vld [vmem:[%s1163_s28 + $0x68] sm:$0xff]  ;;  %v304_v24 = vmax.f32 %v1206_v14, %v1209_v15  ;;  %s702_s13 = sshll.u32 %s1306_s10, 4  ;;  %s1331_s26 = scalar_lea.hbm %s1384_s5, %s809_s11  ;;  %s1333_s13 = int_to_ptr.vmem [resolvable:$true] %s702_s13 }
  0x3d   : > { %v274_v21 = vadd.f32 %v1219_v19, %v1216_v18  ;;  %v277_v25 = vadd.f32 %v1229_v23, %v1226_v22  ;;  %v1236_v26 = vld [vmem:[%s1163_s28 + $0x70] sm:$0xff]  ;;  %v1239_v27 = vld [vmem:[%s1163_s28 + $0x78] sm:$0xff]  ;;  %v307_v28 = vmax.f32 %v1216_v18, %v1219_v19  ;;  %v310_v31 = vmax.f32 %v1226_v22, %v1229_v23  ;;  %v324_v32 = vld [vmem:[%s1380_s1] sm:$0xff]  ;;  %s689_s22 = scalar_lea.sflag [#allocation4], %s1159_s23  ;;  %s948_s28 = scalar_lea.vmem %s1333_s13, 1024 }
  0x3e   : > { %v280_v29 = vadd.f32 %v1239_v27, %v1236_v26  ;;  %v313_v30 = vmax.f32 %v1236_v26, %v1239_v27  ;;  %v325_v33 = vld [vmem:[%s1380_s1 + $0x8] sm:$0xff]  ;;  %v326_v36 = vld [vmem:[%s1380_s1 + $0x10] sm:$0xff]  ;;  %v327_v37 = vld [vmem:[%s1380_s1 + $0x18] sm:$0xff]  ;;  %v347_v57 = vadd.s32 4294967288, %v342_v53  ;;  %v354_v60 = vadd.s32 4294967280, %v342_v53  ;;  %p949_p6 = scmp.ne.s32.totalorder %s1333_s13, %s948_s28  ;;  %p1391_p11 = scmp.ne.s32.totalorder %s1388_s30, 0 }
  0x3f   : > { %269 = vadd.xlane.f32.xlu1 %v268_v10  ;;  %v846_v34 = vpack.c.bf16 %v325_v33, %v324_v32  ;;  %v849_v38 = vpack.c.bf16 %v327_v37, %v326_v36  ;;  %v328_v39 = vld [vmem:[%s1380_s1 + $0x20] sm:$0xff]  ;;  %v329_v40 = vld [vmem:[%s1380_s1 + $0x28] sm:$0xff]  ;;  %v330_v42 = vld [vmem:[%s1380_s1 + $0x30] sm:$0xff]  ;;  %v361_v63 = vadd.s32 4294967272, %v342_v53  ;;  %v1277_v10 = vsub.s32 %v342_v53, %v1273_v56  ;;  %s1022_s29 = smov [#allocation5]  }
  0x40   : > { %263 = vadd.xlane.f32.xlu0 %v262_v11  ;;  %v852_v41 = vpack.c.bf16 %v329_v40, %v328_v39  ;;  %v331_v43 = vld [vmem:[%s1380_s1 + $0x38] sm:$0xff]  ;;  %v350_v7 = vsub.s32 %v347_v57, %v1273_v56  ;;  %v368_v11 = vadd.s32 4294967264, %v342_v53  ;;  %v389_v32 = vadd.s32 4294967240, %v342_v53  ;;  %p950_p12 = pnand %p949_p6, %p1391_p11  ;;  %s952_s12 = sshll.u32 %s1022_s29, 4  ;;  %s953_s12 = int_to_ptr.vmem [resolvable:$false] %s952_s12 }
  0x41   : > { %847 = vmatpush3.bf16.msra.mxu0 %v846_v34  ;;  %v855_v44 = vpack.c.bf16 %v331_v43, %v330_v42  ;;  %v382_v36 = vadd.s32 4294967248, %v342_v53  ;;  %vm380_vm5 = vcmask 392512   ;;  %vm387_vm6 = vcmask 458112   ;;  %s954_s14 = scalar_lea.vmem %s953_s12, 2048  ;;  %p955_p8 = scmp.lt.s32.totalorder %s1333_s13, %s953_s12 }
  0x42   : > { %848 = vmatprep.subr.bf16.mxu0 %v1019_v35  ;;  %v371_v33 = vsub.s32 %v368_v11, %v1273_v56  ;;  %v392_v45 = vsub.s32 %v389_v32, %v1273_v56  ;;  %vm394_vm7 = vcmask 523712   ;;  %vm396_vm8 = vcmask 523264   ;;  %p951_p13 = pneg %p950_p12  ;;  %p956_p10 = scmp.lt.s32.totalorder %s954_s14, %s948_s28 }
  0x43   : > { %296 = vmax.xlane.f32.xlu1 %v295_v12  ;;  %vm478_vm9 = vcmask 64512  }
  0x44   : > { %293 = vmax.xlane.f32.xlu0 %v292_v13  ;;  %p957_p0 = por %p956_p10, %p955_p8 }
  0x45   : > { %850 = vmatpush3.bf16.msra.mxu0 %v849_v38 }
  0x46   : > { %851 = vmatprep.subr.bf16.mxu0 %v1019_v35  ;;  %p958_p2 = pnand %p957_p0, %p951_p13 }
  0x47   : > { %299 = vmax.xlane.f32.xlu1 %v298_v16 }
  0x48   : > { %272 = vadd.xlane.f32.xlu0 %v271_v17 }
  0x49   : > { %853 = vmatpush3.bf16.msra.mxu0 %v852_v41 }
  0x4a   : > { %854 = vmatprep.subr.bf16.mxu0 %v1019_v35 }
  0x4b   : > { %302 = vmax.xlane.f32.xlu1 %v301_v20 }
  0x4c   : > { %275 = vadd.xlane.f32.xlu0 %v274_v21  ;;  %v375_v21 = vadd.s32 4294967256, %v342_v53 }
  0x4d   : > { %856 = vmatpush3.bf16.msra.mxu0 %v855_v44 }
  0x4e   : > { %v378_v39 = vsub.s32 %v375_v21, %v1273_v56 }
  0x4f   : > { %305 = vmax.xlane.f32.xlu1 %v304_v24  ;;  %v357_v24 = vsub.s32 %v354_v60, %v1273_v56 }
  0x50   : > { %278 = vadd.xlane.f32.xlu0 %v277_v25 }
  0x53   : > { %308 = vmax.xlane.f32.xlu1 %v307_v28 }
  0x54   : > { %281 = vadd.xlane.f32.xlu0 %v280_v29  ;;  %v364_v29 = vsub.s32 %v361_v63, %v1273_v56 }
  0x57   : > { %314 = vmax.xlane.f32.xlu1 %v313_v30 }
  0x58   : > { %311 = vmax.xlane.f32.xlu0 %v310_v31 }
  0xc8   : > { %v267_v46 = vpop.xlane.xlu1 %266 }
  0xc9   : > { %v261_v47 = vpop.xlane.xlu0 %260  ;;  %v286_v3 = vmul.f32 0.00390625, %v267_v46 }
  0xca   : > { %v284_v61 = vmul.f32 0.00390625, %v261_v47 }
  0xcc   : > { %v270_v48 = vpop.xlane.xlu1 %269 }
  0xcd   : > { %v264_v49 = vpop.xlane.xlu0 %263  ;;  %v287_v13 = vmul.f32 0.00390625, %v270_v48 }
  0xce   : > { %v285_v62 = vmul.f32 0.00390625, %v264_v49  ;;  %v385_v49 = vsub.s32 %v382_v36, %v1273_v56  ;;  %v494_v36 = vld [vmem:[%s1382_s3] sm:$0xff] }
  0xcf   : > { %841 = vmatpush3.msra.mxu1 %v494_v36 }
  0xd0   : > { %v297_v51 = vpop.xlane.xlu1 %296 }
  0xd1   : > { %v294_v52 = vpop.xlane.xlu0 %293  ;;  %v317_v16 = vadd.f32 %v297_v51, %v285_v62 }
  0xd2   : > { %v316_v17 = vadd.f32 %v294_v52, %v284_v61 }
  0xd3   : > { %v351_v37 = vrot.slane %v317_v16, %v350_v7 }
  0xd4   : > { %v300_v54 = vpop.xlane.xlu1 %299  ;;  %v346_v38 = vrot.slane %v316_v17, %v1277_v10 }
  0xd5   : > { %v273_v55 = vpop.xlane.xlu0 %272  ;;  %v318_v25 = vadd.f32 %v300_v54, %v286_v3  ;;  %v332_v3 = vld [vmem:[%s1381_s2] sm:$0x1] }
  0xd6   : > { %v288_v28 = vmul.f32 0.00390625, %v273_v55  ;;  %v353_v50 = vsel %vm352_vm1, %v351_v37, %v346_v38 }
  0xd7   : > { %v358_v42 = vrot.slane %v318_v25, %v357_v24 }
  0xd8   : > { %v303_v58 = vpop.xlane.xlu1 %302 }
  0xd9   : > { %v276_v59 = vpop.xlane.xlu0 %275  ;;  %v319_v30 = vadd.f32 %v303_v58, %v287_v13  ;;  %v360_v54 = vsel %vm359_vm2, %v358_v42, %v353_v50 }
  0xda   : > { %v289_v31 = vmul.f32 0.00390625, %v276_v59 }
  0xdb   : > { %v365_v43 = vrot.slane %v319_v30, %v364_v29 }
  0xdc   : > { %v306_v12 = vpop.xlane.xlu1 %305 }
  0xdd   : > { %v279_v20 = vpop.xlane.xlu0 %278  ;;  %v320_v34 = vadd.f32 %v306_v12, %v288_v28  ;;  %v367_v57 = vsel %vm366_vm3, %v365_v43, %v360_v54  ;;  %v472_v12 = vsub.s32 0, %v1273_v56 }
  0xde   : > { %v290_v47 = vmul.f32 0.00390625, %v279_v20 }
  0xdf   : > { %v372_v46 = vrot.slane %v320_v34, %v371_v33 }
  0xe0   : > { %v309_v35 = vpop.xlane.xlu1 %308 }
  0xe1   : > { %v321_v40 = vadd.f32 %v309_v35, %v289_v31  ;;  %v282_v41 = vpop.xlane.xlu0 %281  ;;  %v374_v59 = vsel %vm373_vm4, %v372_v46, %v367_v57 }
  0xe2   : > { %v291_v44 = vmul.f32 0.00390625, %v282_v41 }
  0xe3   : > { %v379_v51 = vrot.slane %v321_v40, %v378_v39  ;;  %v495_v39 = vld [vmem:[%s1383_s4] sm:$0x1] }
  0xe4   : > { %v315_v48 = vpop.xlane.xlu1 %314 }
  0xe5   : > { %v323_v52 = vadd.f32 %v315_v48, %v291_v44  ;;  %v312_v53 = vpop.xlane.xlu0 %311  ;;  %v381_v61 = vsel %vm380_vm5, %v379_v51, %v374_v59 }
  0xe6   : > { %v322_v55 = vadd.f32 %v312_v53, %v290_v47 }
  0xe7   : > { %v393_v58 = vrot.slane %v323_v52, %v392_v45 }
  0xe8   : > { %v386_v60 = vrot.slane %v322_v55, %v385_v49 }
  0xea   : > { %v388_v62 = vsel %vm387_vm6, %v386_v60, %v381_v61 }
  0xeb   : > { %v395_v63 = vsel %vm394_vm7, %v393_v58, %v388_v62 }
  0xec   : > { %838 = vmatmul.mubr.msk.f32.vlgmr.msra.gmra.mrb[0].mxu0 %vm396_vm8, %v395_v63 }
 0x1bf   : > { %v465_v7 = vpop.f32.mrb[0].mxu0 }
 0x1c0   : > { %v466_v11 = vadd.f32 %v465_v7, %v332_v3  ;;  %v839_v13 = vpop.f32.mrb[1].mxu0 }
 0x1c2   : > { %v469_v16 = vmax.f32 %v466_v11, 0.0 }
 0x1c4   : > { %v473_v17 = vrot.slane %v469_v16, %v472_v12 }
 0x1c6   : > { %475 = vbcast.lane.b32.xlu0 %v473_v17, 256 }
 0x238   : > { %v476_v20 = vpop.permute.xlu0 %475 }
 0x239   : > { %v477_v21 = vmul.f32 %v476_v20, %v473_v17 }
 0x23b   : > { %v479_v24 = vsel %vm478_vm9, %v477_v21, -inf }
 0x23c   : > { %480 = vmax.xlane.f32.xlu1 %v479_v24 }
 0x2c9   : > { %v481_v25 = vpop.xlane.xlu1 %480 }
 0x2ca   : > { %v482_v28 = vsub.f32 %v477_v21, %v481_v25 }
 0x2cc   : > { %v483_v29 = vmul.f32 1.442695, %v482_v28 }
 0x2ce   : > { %910 = vpow2.f32 %v483_v29 }
 0x2d8   : > { %v911_v30 = vpop.eup %910 }
 0x2d9   : > { %v485_v31 = vsel %vm478_vm9, %v911_v30, 0.0 }
 0x2da   : > { %486 = vadd.xlane.f32.xlu1 %v485_v31 }
 0x367   : > { %v487_v32 = vpop.xlane.xlu1 %486 }
 0x368   : > { %912 = vrcp.f32 %v487_v32 }
 0x372   : > { %v913_v56 = vpop.eup %912 }
 0x373   : > { %v489_v33 = vmul.f32 %v913_v56, %v911_v30 }
 0x375   : > { %v490_v34 = vmul.f32 %v489_v33, %v473_v17 }
 0x377   : > { %v491_v35 = vsel %vm478_vm9, %v490_v34, 0.0 }
 0x378   : > { %492 = vadd.xlane.f32.xlu1 %v491_v35 }
 0x405   : > { %v493_v37 = vpop.xlane.xlu1 %492 }
 0x406   : > { %v500_v38 = vrot.slane %v493_v37, %v1277_v10 }
 0x408   : > { %843 = vmatmul.mubr.msk.f32.vlgmr.msra.gmra.mrb[0].mxu1 %vm478_vm9, %v500_v38 }
 0x4db   : > { %v569_v40 = vpop.f32.mrb[0].mxu1 }
 0x4dc   : > { %v570_v41 = vadd.f32 %v569_v40, %v495_v39  ;;  %v844_v42 = vpop.f32.mrb[1].mxu1 }
 0x4de   : > { %v573_v43 = vmax.f32 %v570_v41, 0.0 }
 0x4e0   : > { %v786_v44 = vmul.f32 -1.442695, %v573_v43 }
 0x4e2   : > { %914 = vpow2.f32 %v786_v44 }
 0x4ec   : > { %v915_v45 = vpop.eup %914 }
 0x4ed   : > { %v577_v46 = vadd.f32 1.0, %v915_v45 }
 0x4ef   : > { %916 = vrcp.f32 %v577_v46 }
 0x4f9   : > { %v917_v47 = vpop.eup %916 }
 0x4fa   : > { %v580_v48 = vadd.f32 1.0, %v917_v47 }
 0x4fc   : > { %v584_v49 = vrot.slane %v580_v48, %v472_v12 }
 0x4fe   : > { %590 = vbcast.lane.b32.xlu0 %v584_v49, 264  ;;  %586 = vbcast.lane.b32.xlu1 %v584_v49, 256 }
 0x502   : > { %594 = vbcast.lane.b32.xlu0 %v584_v49, 272  ;;  %598 = vbcast.lane.b32.xlu1 %v584_v49, 280 }
 0x506   : > { %602 = vbcast.lane.b32.xlu0 %v584_v49, 288  ;;  %606 = vbcast.lane.b32.xlu1 %v584_v49, 296 }
 0x50a   : > { %610 = vbcast.lane.b32.xlu0 %v584_v49, 304  ;;  %614 = vbcast.lane.b32.xlu1 %v584_v49, 312 }
 0x570   : > { %v591_v10 = vpop.permute.xlu0 %590  ;;  %v587_v50 = vpop.permute.xlu1 %586 }
 0x571   : > { %v618_v51 = vmul.f32 %v591_v10, %v1192_v8  ;;  %v619_v52 = vmul.f32 %v591_v10, %v1195_v9  ;;  %v616_v53 = vmul.f32 %v587_v50, %v1176_v2  ;;  %v617_v54 = vmul.f32 %v587_v50, %v1181_v4 }
 0x573   : > { %v802_v55 = vpack.c.bf16 %v619_v52, %v618_v51  ;;  %v801_v57 = vpack.c.bf16 %v617_v54, %v616_v53 }
 0x574   : > { %v595_v58 = vpop.permute.xlu0 %594  ;;  %v599_v59 = vpop.permute.xlu1 %598 }
 0x575   : > { %681 = vst [vmem:[%s1306_s10 + $0x8] sm:$0xff] %v802_v55  ;;  %680 = vst [vmem:[%s1306_s10] sm:$0xff] %v801_v57  ;;  %v620_v8 = vmul.f32 %v595_v58, %v1170_v0  ;;  %v621_v9 = vmul.f32 %v595_v58, %v1173_v1  ;;  %v622_v2 = vmul.f32 %v599_v59, %v1184_v5 }
 0x576   : > { %v623_v4 = vmul.f32 %v599_v59, %v1187_v6 }
 0x577   : > { %v803_v60 = vpack.c.bf16 %v621_v9, %v620_v8 }
 0x578   : > { %v804_v61 = vpack.c.bf16 %v623_v4, %v622_v2  ;;  %v603_v62 = vpop.permute.xlu0 %602  ;;  %v607_v63 = vpop.permute.xlu1 %606 }
 0x579   : > { %682 = vst [vmem:[%s1306_s10 + $0x10] sm:$0xff] %v803_v60  ;;  %v624_v3 = vmul.f32 %v603_v62, %v1206_v14  ;;  %v625_v0 = vmul.f32 %v603_v62, %v1209_v15  ;;  %v626_v7 = vmul.f32 %v607_v63, %v1216_v18  ;;  %v627_v1 = vmul.f32 %v607_v63, %v1219_v19 }
 0x57a   : > { %683 = vst [vmem:[%s1306_s10 + $0x18] sm:$0xff] %v804_v61 }
 0x57b   : > { %v805_v11 = vpack.c.bf16 %v625_v0, %v624_v3  ;;  %v806_v5 = vpack.c.bf16 %v627_v1, %v626_v7 }
 0x57c   : > { %v611_v6 = vpop.permute.xlu0 %610  ;;  %v615_v12 = vpop.permute.xlu1 %614 }
 0x57d   : > { %684 = vst [vmem:[%s1306_s10 + $0x20] sm:$0xff] %v805_v11  ;;  %685 = vst [vmem:[%s1306_s10 + $0x28] sm:$0xff] %v806_v5  ;;  %v628_v14 = vmul.f32 %v611_v6, %v1226_v22  ;;  %v629_v15 = vmul.f32 %v611_v6, %v1229_v23  ;;  %v630_v18 = vmul.f32 %v615_v12, %v1236_v26 }
 0x57e   : > { %v631_v19 = vmul.f32 %v615_v12, %v1239_v27 }
 0x57f   : > { %v807_v13 = vpack.c.bf16 %v629_v15, %v628_v14 }
 0x580   : > { %v808_v16 = vpack.c.bf16 %v631_v19, %v630_v18 }
 0x581   : > { %686 = vst [vmem:[%s1306_s10 + $0x30] sm:$0xff] %v807_v13 }
 0x582   : > { %687 = vst [vmem:[%s1306_s10 + $0x38] sm:$0xff] %v808_v16 }
 0x583   : > { %961 = shalt.err (!%p958_p2)
}
 0x584   : > { %s962_s15 = scalar_lea.hbm %s1331_s26, 1024  ;;  %s966_s7 = scalar_lea.hbm %s1384_s5, 2048 }
 0x585   : > { %p963_p4 = scmp.ne.s32.totalorder %s1331_s26, %s962_s15  ;;  %p967_p9 = scmp.lt.u32.totalorder %s1331_s26, %s1384_s5 }
 0x586   : > { %p968_p1 = scmp.lt.u32.totalorder %s966_s7, %s962_s15  ;;  %p970_p6 = scmp.lt.u32.totalorder %s962_s15, %s1331_s26 }
 0x587   : > { %p964_p5 = pnand %p963_p4, %p1391_p11 }
 0x588   : > { %p969_p3 = por %p968_p1, %p967_p9 }
 0x589   : > { %p965_p7 = pneg %p964_p5 }
 0x58a   : > { %p971_p12 = por %p970_p6, %p969_p3 }
 0x58c   : > { %p972_p13 = pnand %p971_p12, %p965_p7 }
 0x58e   : > { %975 = shalt.err (!%p972_p13)
}
 0x58f   : > { %s1023_s11 = smov 128   ;;  %s1024_s17 = smov 8  }
 0x590   : > { %859 = dma.vmem_to_hbm [thread:$0]  (%p1391_p11), %s1333_s13, 1024, %s1331_s26, %s689_s22, %s1023_s11, %s1023_s11, %s1024_s17  }
 0x591 PF: > { %s717_s25 = sand.u32 1, %s1002_s18   ;;  %p1392_p8 = scmp.ne.s32.totalorder %s1389_s6, 0 }
 0x592   : > { %p1393_p10 = scmp.ge.s32.totalorder %s1014_s21, 2  ;;  %s718_s28 = scalar_lea.sflag [#allocation4], %s717_s25 }
 0x594   : > { %p866_p0 = pnand %p1393_p10, %p1392_p8 }
 0x596   : > { %997 = dma.done.wait (!%p866_p0), %s718_s28, 1024  }
 0x597   : > { %999 = vsyncadd (!%p866_p0), %s718_s28, 4294966272  ;;  %p18_p2 = scmp.ge.s32.totalorder %s1080_s24, 4   ;;  %s1394_s18 = smov %s1006_s19 }
 0x598   : > { %s1395_s19 = smov %s1010_s20  ;;  %s1396_s20 = smov %s1092_s27 }
 0x599   : > { %s1397_s21 = smov %s1080_s24  ;;  %20 = sbr.rel (!%p18_p2) target bundleno = 5 (0x5), region = 85 }
 0x5a0   :  { %723 = vsyncpa [#allocation3], 1 }
 0x5a1   :  { %725 = vsyncpa [#allocation3 + $0x1], 1 }
 0x5a2   :  { %726 = vsyncpa [#allocation4], 1 }
 0x5a3   :  { %728 = vsyncpa [#allocation4 + $0x1], 1 }

</bundles_post_ra>
